<compile_context>
chip_gen: v6e
topology: v6e:2x2x1
jax: 0.10.0
libtpu: 0.0.40
codegen_flags: <defaults>
</compile_context>

<pallas_src>
import jax
import jax.numpy as jnp
import numpy as np
from jax.experimental import pallas as pl
from jax.experimental.pallas import tpu as pltpu


def _make_kernel(rows, t_eff):
    """Kernel over (d, t_eff) column tiles of the class-major (d, rows) layout."""

    def kernel(pred_ref, tgt_ref, ce_ref, cnt_ref):
        i = pl.program_id(0)

        # Output blocks have a constant index map -> they stay resident in VMEM
        # across the whole (reduction) grid and are written back to HBM once.
        @pl.when(i == 0)
        def _():
            ce_ref[...] = jnp.zeros_like(ce_ref)
            cnt_ref[...] = jnp.zeros_like(cnt_ref)

        # All math in f32 (v5e has no bf16 VPU/EUP path).
        pred = pred_ref[...].astype(jnp.float32)   # (d, T)  classes on sublanes
        tgt = tgt_ref[...].astype(jnp.float32)     # (d, T)  int8 -> f32 (exact 0/1)

        # Global column (== flattened row of the original layout) of each lane;
        # masks the ragged tail of the last block (stale VMEM there is select-ed
        # away by jnp.where, so NaN/Inf in the pad region cannot leak into sums).
        col = i * t_eff + jax.lax.broadcasted_iota(jnp.int32, (1, t_eff), 1)
        in_range = col < rows                                           # (1, T)
        nonzero = jnp.max(jnp.abs(tgt), axis=0, keepdims=True) > 0.0    # (1, T)
        mask = jnp.logical_and(nonzero, in_range)                       # (1, T)

        # log-softmax over the class (sublane) axis; log(1-p) rebuilt from the
        # same pieces (s - e >= 0 always holds in f32 for sums of positives, and
        # log(0) -> -inf is clamped exactly like PyTorch BCELoss's -100 clamp).
        m = jnp.max(pred, axis=0, keepdims=True)           # (1, T)
        e = jnp.exp(pred - m)                               # (d, T)  EUP
        s = jnp.sum(e, axis=0, keepdims=True)               # (1, T)
        logs = jnp.log(s)                                   # (1, T)  EUP (1 row)
        logp = jnp.maximum(pred - m - logs, -100.0)         # (d, T)
        log1mp = jnp.maximum(jnp.log(s - e) - logs, -100.0)  # (d, T)  EUP

        # General BCE form (keeps PyTorch semantics even for non-one-hot targets).
        loss = -(tgt * logp + (1.0 - tgt) * log1mp)          # (d, T)
        loss = jnp.where(mask, loss, 0.0)

        ce_ref[...] += jnp.sum(loss, axis=1, keepdims=True)                    # (d, 1)
        cnt_ref[...] += jnp.sum(mask.astype(jnp.int32), axis=1, keepdims=True)  # (1, 1)

    return kernel


def _masked_ce_sums(pred, target):
    """Per-class BCE(softmax(pred), target) sums over rows where target != 0.

    Returns (per-class BCE sum over valid rows [f32 (d,)], valid-row count [i32]).
    """
    d = pred.shape[-1]
    rows = 1
    for s in pred.shape[:-1]:
        rows *= int(s)

    # Class-major relayout: classes on sublanes, rows lane-dense.
    # target is narrowed to int8 first (exact for the 0/1 one-hot targets this
    # module receives) so its relayout + kernel DMA are 4x cheaper.
    pred_t = pred.reshape(rows, d).T                      # (d, rows) f32
    tgt_t = target.reshape(rows, d).astype(jnp.int8).T    # (d, rows) int8

    # Tile width: largest lane-dense tile that keeps temporaries + double-buffered
    # inputs comfortably inside 32 MiB scoped VMEM (tighter cap for wide d).
    t_cap = 32768 if d <= 8 else 16384
    if rows <= t_cap:
        t_eff = rows            # single full-extent block (always a legal block)
    else:
        t_eff = t_cap           # multiple of 128; ragged tail masked in-kernel
    nblocks = pl.cdiv(rows, t_eff)

    ce, cnt = pl.pallas_call(
        _make_kernel(rows, t_eff),
        out_shape=(
            jax.ShapeDtypeStruct((d, 1), jnp.float32),
            jax.ShapeDtypeStruct((1, 1), jnp.int32),
        ),
        grid_spec=pltpu.PrefetchScalarGridSpec(
            num_scalar_prefetch=0,
            grid=(nblocks,),
            in_specs=[
                pl.BlockSpec((d, t_eff), lambda i: (0, i)),
                pl.BlockSpec((d, t_eff), lambda i: (0, i)),
            ],
            out_specs=(
                pl.BlockSpec((d, 1), lambda i: (0, 0)),
                pl.BlockSpec((1, 1), lambda i: (0, 0)),
            ),
        ),
        compiler_params=pltpu.CompilerParams(
            # Single reduction axis; no multi-core split (v5e/v6e are single-TC and
            # the plain "parallel" split added only overhead + duplicated blocks).
            dimension_semantics=("arbitrary",),
            vmem_limit_bytes=32 * 1024 * 1024,
        ),
    )(pred_t, tgt_t)

    return ce[:, 0], cnt[0, 0]


masked_ce_sums = jax.jit(_masked_ce_sums)


# --- pure-JAX reference (mirrors the PyTorch CEPerClass.update exactly) ---
def _ref_ce_sums(pred, target):
    d = pred.shape[-1]
    p2 = pred.reshape(-1, d).astype(jnp.float32)
    t2 = target.reshape(-1, d).astype(jnp.float32)
    mask = jnp.any(t2 != 0.0, axis=-1)
    prob = jax.nn.softmax(p2, axis=-1)
    logp = jnp.maximum(jnp.log(prob), -100.0)
    log1mp = jnp.maximum(jnp.log(1.0 - prob), -100.0)
    loss = -(t2 * logp + (1.0 - t2) * log1mp)
    loss = jnp.where(mask[:, None], loss, 0.0)
    return loss.sum(axis=0), mask.sum().astype(jnp.int32)


_ATOM_CE_NAMES = {
    'H': 'HydrogenCE', 'C': 'CarbonCE', 'N': 'NitroCE', 'O': 'OxyCE',
    'F': 'FluorCE', 'B': 'BoronCE', 'Br': 'BrCE', 'Cl': 'ClCE',
    'I': 'IodineCE', 'P': 'PhosphorusCE', 'S': 'SulfurCE',
    'Se': 'SeCE', 'Si': 'SiCE',
}
_BOND_CE_NAMES = ['NoBondCE', 'SingleCE', 'DoubleCE', 'TripleCE']


class TrainMolecularMetricsDiscrete:
    """JAX/Pallas port. State (total_ce / total_samples) kept as jnp arrays."""

    def __init__(self, atom_decoder):
        self.atom_names = [_ATOM_CE_NAMES[a] for a in atom_decoder]
        self.reset()

    def reset(self):
        na = len(self.atom_names)
        self.atom_ce = jnp.zeros((na,), jnp.float32)
        self.atom_samples = jnp.zeros((), jnp.int32)
        self.bond_ce = jnp.zeros((4,), jnp.float32)
        self.bond_samples = jnp.zeros((), jnp.int32)

    def __call__(self, masked_pred_X, masked_pred_E, true_X, true_E, log=False):
        # Note: the atom tensor is tiny (bs*n rows); a pure-XLA path would also be
        # fine there, but both streams go through the Pallas kernel here.
        a_ce, a_cnt = masked_ce_sums(masked_pred_X, true_X)
        b_ce, b_cnt = masked_ce_sums(masked_pred_E, true_E)
        self.atom_ce = self.atom_ce + a_ce
        self.atom_samples = self.atom_samples + a_cnt
        self.bond_ce = self.bond_ce + b_ce
        self.bond_samples = self.bond_samples + b_cnt
        # TODO(synk): swanlab logging / .item() host I/O has no Pallas equivalent.
        if log:
            _ = self.compute()
        return None

    def compute(self):
        out = {}
        a_den = self.atom_samples.astype(jnp.float32)
        b_den = self.bond_samples.astype(jnp.float32)
        for i, name in enumerate(self.atom_names):
            out[name] = self.atom_ce[i] / a_den
        for i, name in enumerate(_BOND_CE_NAMES):
            out[name] = self.bond_ce[i] / b_den
        return out


if __name__ == "__main__":
    key = jax.random.PRNGKey(0)
    bs, n = 2, 16
    atom_decoder = ['H', 'C', 'N', 'O', 'F']   # dx = 5
    dx, de = len(atom_decoder), 4

    k1, k2, k3, k4, k5, k6 = jax.random.split(key, 6)

    # predictions: logits
    masked_pred_X = jax.random.normal(k1, (bs, n, dx), dtype=jnp.float32)
    masked_pred_E = jax.random.normal(k2, (bs, n, n, de), dtype=jnp.float32)

    # targets: one-hot, with some rows zeroed out (masked / padding nodes)
    x_labels = jax.random.randint(k3, (bs, n), 0, dx)
    true_X = jax.nn.one_hot(x_labels, dx, dtype=jnp.float32)
    x_valid = (jax.random.uniform(k4, (bs, n)) > 0.25).astype(jnp.float32)
    true_X = true_X * x_valid[..., None]

    e_labels = jax.random.randint(k5, (bs, n, n), 0, de)
    true_E = jax.nn.one_hot(e_labels, de, dtype=jnp.float32)
    e_valid = (jax.random.uniform(k6, (bs, n, n)) > 0.25).astype(jnp.float32)
    true_E = true_E * e_valid[..., None]

    metrics = TrainMolecularMetricsDiscrete(atom_decoder)
    metrics(masked_pred_X, masked_pred_E, true_X, true_E, log=False)
    results = metrics.compute()
    jax.block_until_ready(list(results.values()))
    jax.block_until_ready((metrics.atom_ce, metrics.bond_ce))

    # verify against a pure-JAX reference of the PyTorch semantics
    ref_a_ce, ref_a_cnt = _ref_ce_sums(masked_pred_X, true_X)
    ref_b_ce, ref_b_cnt = _ref_ce_sums(masked_pred_E, true_E)
    np.testing.assert_allclose(np.asarray(metrics.atom_ce), np.asarray(ref_a_ce),
                               rtol=1e-4, atol=1e-3)
    np.testing.assert_allclose(np.asarray(metrics.bond_ce), np.asarray(ref_b_ce),
                               rtol=1e-4, atol=1e-3)
    assert int(metrics.atom_samples) == int(ref_a_cnt)
    assert int(metrics.bond_samples) == int(ref_b_cnt)

    print("KERNEL_OK")
</pallas_src>

<mosaic_0001>
module attributes {stable_mosaic.version = 11 : i64} {
  func.func @kernel(%arg0: i32, %arg1: memref<5x32xf32, #tpu.memory_space<vmem>>, %arg2: memref<5x32xi8, #tpu.memory_space<vmem>>, %arg3: memref<5x1xf32, #tpu.memory_space<vmem>>, %arg4: memref<1x1xi32, #tpu.memory_space<vmem>>) attributes {dimension_semantics = [#tpu.dimension_semantics<arbitrary>], iteration_bounds = array<i64: 1>, scalar_prefetch = 0 : i64, scratch_operands = 0 : i64, tpu.core_type = #tpu.core_type<tc>, window_params = [{transform_indices = @transform_0, window_bounds = array<i64: 5, 32>}, {transform_indices = @transform_1, window_bounds = array<i64: 5, 32>}, {pipeline_mode = #tpu.pipeline_mode<synchronous>, transform_indices = @transform_2, window_bounds = array<i64: 5, 1>}, {pipeline_mode = #tpu.pipeline_mode<synchronous>, transform_indices = @transform_3, window_bounds = array<i64: 1, 1>}]} {
    %c0_i32 = arith.constant 0 : i32
    %0 = arith.cmpi eq, %arg0, %c0_i32 : i32
    %1 = arith.extui %0 : i1 to i32
    %c0_i32_0 = arith.constant 0 : i32
    %2 = arith.cmpi ne, %1, %c0_i32_0 : i32
    scf.if %2 {
      %cst_23 = arith.constant 0.000000e+00 : f32
      %61 = vector.broadcast %cst_23 : f32 to vector<5x1xf32>
      %c0_24 = arith.constant 0 : index
      %c0_25 = arith.constant 0 : index
      %62 = vector.load %arg3[%c0_24, %c0_25] : memref<5x1xf32, #tpu.memory_space<vmem>>, vector<5x1xf32>
      tpu.vector_store %arg3[%c0_24, %c0_25], %61 {strides = array<i32>} : memref<5x1xf32, #tpu.memory_space<vmem>>, vector<5x1xf32>,
      %c0_i32_26 = arith.constant 0 : i32
      %63 = vector.broadcast %c0_i32_26 : i32 to vector<1x1xi32>
      %c0_27 = arith.constant 0 : index
      %c0_28 = arith.constant 0 : index
      %64 = vector.load %arg4[%c0_27, %c0_28] : memref<1x1xi32, #tpu.memory_space<vmem>>, vector<1x1xi32>
      tpu.vector_store %arg4[%c0_27, %c0_28], %63 {strides = array<i32>} : memref<1x1xi32, #tpu.memory_space<vmem>>, vector<1x1xi32>,
    } else {
    }
    %c0 = arith.constant 0 : index
    %c0_1 = arith.constant 0 : index
    %3 = vector.load %arg1[%c0, %c0_1] : memref<5x32xf32, #tpu.memory_space<vmem>>, vector<5x32xf32>
    %c0_2 = arith.constant 0 : index
    %c0_3 = arith.constant 0 : index
    %4 = vector.load %arg2[%c0_2, %c0_3] : memref<5x32xi8, #tpu.memory_space<vmem>>, vector<5x32xi8>
    %5 = arith.sitofp %4 : vector<5x32xi8> to vector<5x32xf32>
    %c32_i32 = arith.constant 32 : i32
    %6 = arith.muli %arg0, %c32_i32 : i32
    %7 = tpu.iota {dimensions = array<i32: 1>} : vector<1x32xi32>
    %8 = vector.broadcast %6 : i32 to vector<1x32xi32>
    %9 = arith.addi %8, %7 : vector<1x32xi32>
    %c32_i32_4 = arith.constant 32 : i32
    %10 = vector.broadcast %c32_i32_4 : i32 to vector<1x32xi32>
    %11 = arith.cmpi slt, %9, %10 : vector<1x32xi32>
    %12 = math.absf %5 : vector<5x32xf32>
    %cst = arith.constant dense<0xFF800000> : vector<32xf32>
    %13 = vector.multi_reduction <maximumf>, %12, %cst [0] : vector<5x32xf32> to vector<32xf32>
    %14 = vector.shape_cast %13 : vector<32xf32> to vector<1x32xf32>
    %cst_5 = arith.constant 0.000000e+00 : f32
    %15 = vector.broadcast %cst_5 : f32 to vector<1x32xf32>
    %16 = arith.cmpf ogt, %14, %15 : vector<1x32xf32>
    %17 = arith.andi %16, %11 : vector<1x32xi1>
    %cst_6 = arith.constant dense<0xFF800000> : vector<32xf32>
    %18 = vector.multi_reduction <maximumf>, %3, %cst_6 [0] : vector<5x32xf32> to vector<32xf32>
    %19 = vector.shape_cast %18 : vector<32xf32> to vector<1x32xf32>
    %20 = vector.broadcast %19 : vector<1x32xf32> to vector<5x32xf32>
    %21 = arith.subf %3, %20 : vector<5x32xf32>
    %22 = math.exp %21 : vector<5x32xf32>
    %cst_7 = arith.constant dense<0.000000e+00> : vector<32xf32>
    %23 = vector.multi_reduction <add>, %22, %cst_7 [0] : vector<5x32xf32> to vector<32xf32>
    %24 = vector.shape_cast %23 : vector<32xf32> to vector<1x32xf32>
    %25 = math.log %24 : vector<1x32xf32>
    %26 = vector.broadcast %19 : vector<1x32xf32> to vector<5x32xf32>
    %27 = arith.subf %3, %26 : vector<5x32xf32>
    %28 = vector.broadcast %25 : vector<1x32xf32> to vector<5x32xf32>
    %29 = arith.subf %27, %28 : vector<5x32xf32>
    %cst_8 = arith.constant -1.000000e+02 : f32
    %30 = vector.broadcast %cst_8 : f32 to vector<5x32xf32>
    %31 = arith.maximumf %29, %30 : vector<5x32xf32>
    %32 = vector.broadcast %24 : vector<1x32xf32> to vector<5x32xf32>
    %33 = arith.subf %32, %22 : vector<5x32xf32>
    %34 = math.log %33 : vector<5x32xf32>
    %35 = vector.broadcast %25 : vector<1x32xf32> to vector<5x32xf32>
    %36 = arith.subf %34, %35 : vector<5x32xf32>
    %cst_9 = arith.constant -1.000000e+02 : f32
    %37 = vector.broadcast %cst_9 : f32 to vector<5x32xf32>
    %38 = arith.maximumf %36, %37 : vector<5x32xf32>
    %39 = arith.mulf %5, %31 : vector<5x32xf32>
    %cst_10 = arith.constant 1.000000e+00 : f32
    %40 = vector.broadcast %cst_10 : f32 to vector<5x32xf32>
    %41 = arith.subf %40, %5 : vector<5x32xf32>
    %42 = arith.mulf %41, %38 : vector<5x32xf32>
    %43 = arith.addf %39, %42 : vector<5x32xf32>
    %cst_11 = arith.constant 0.000000e+00 : f32
    %44 = vector.broadcast %cst_11 : f32 to vector<5x32xf32>
    %45 = arith.subf %44, %43 : vector<5x32xf32>
    %cst_12 = arith.constant 0.000000e+00 : f32
    %46 = vector.shape_cast %17 : vector<1x32xi1> to vector<1x32xi1>
    %47 = vector.broadcast %46 : vector<1x32xi1> to vector<5x32xi1>
    %48 = vector.broadcast %cst_12 : f32 to vector<5x32xf32>
    %49 = arith.select %47, %45, %48 : vector<5x32xi1>, vector<5x32xf32>
    %c0_13 = arith.constant 0 : index
    %c0_14 = arith.constant 0 : index
    %50 = vector.load %arg3[%c0_13, %c0_14] : memref<5x1xf32, #tpu.memory_space<vmem>>, vector<5x1xf32>
    %cst_15 = arith.constant dense<0.000000e+00> : vector<5xf32>
    %51 = vector.multi_reduction <add>, %49, %cst_15 [1] : vector<5x32xf32> to vector<5xf32>
    %52 = vector.shape_cast %51 : vector<5xf32> to vector<5x1xf32>
    %53 = arith.addf %50, %52 : vector<5x1xf32>
    %c0_16 = arith.constant 0 : index
    %c0_17 = arith.constant 0 : index
    %54 = vector.load %arg3[%c0_16, %c0_17] : memref<5x1xf32, #tpu.memory_space<vmem>>, vector<5x1xf32>
    tpu.vector_store %arg3[%c0_16, %c0_17], %53 {strides = array<i32>} : memref<5x1xf32, #tpu.memory_space<vmem>>, vector<5x1xf32>,
    %c0_18 = arith.constant 0 : index
    %c0_19 = arith.constant 0 : index
    %55 = vector.load %arg4[%c0_18, %c0_19] : memref<1x1xi32, #tpu.memory_space<vmem>>, vector<1x1xi32>
    %56 = arith.extui %17 : vector<1x32xi1> to vector<1x32xi32>
    %cst_20 = arith.constant dense<0> : vector<1xi32>
    %57 = vector.multi_reduction <add>, %56, %cst_20 [1] : vector<1x32xi32> to vector<1xi32>
    %58 = vector.shape_cast %57 : vector<1xi32> to vector<1x1xi32>
    %59 = arith.addi %55, %58 : vector<1x1xi32>
    %c0_21 = arith.constant 0 : index
    %c0_22 = arith.constant 0 : index
    %60 = vector.load %arg4[%c0_21, %c0_22] : memref<1x1xi32, #tpu.memory_space<vmem>>, vector<1x1xi32>
    tpu.vector_store %arg4[%c0_21, %c0_22], %59 {strides = array<i32>} : memref<1x1xi32, #tpu.memory_space<vmem>>, vector<1x1xi32>,
    return
  }
  func.func @transform_0(%arg0: i32) -> (i32, i32) {
    %c0_i32 = arith.constant 0 : i32
    %c0_i32_0 = arith.constant 0 : i32
    return %c0_i32, %arg0 : i32, i32
  }
  func.func @transform_1(%arg0: i32) -> (i32, i32) {
    %c0_i32 = arith.constant 0 : i32
    %c0_i32_0 = arith.constant 0 : i32
    return %c0_i32, %arg0 : i32, i32
  }
  func.func @transform_2(%arg0: i32) -> (i32, i32) {
    %c0_i32 = arith.constant 0 : i32
    %c0_i32_0 = arith.constant 0 : i32
    %c0_i32_1 = arith.constant 0 : i32
    return %c0_i32, %c0_i32_0 : i32, i32
  }
  func.func @transform_3(%arg0: i32) -> (i32, i32) {
    %c0_i32 = arith.constant 0 : i32
    %c0_i32_0 = arith.constant 0 : i32
    %c0_i32_1 = arith.constant 0 : i32
    return %c0_i32, %c0_i32_0 : i32, i32
  }
}

</mosaic_0001>

<bundles_post_ra>
// kernel: _masked_ce_sums.1
= control target key start
LH: loop header
LB: loop body
LE: loop exit
PB: predicated region body
PF: predicated region fallthrough
CT: control target
= control target key end

     0   :  { %vm33_vm0 = vcmask 258048   ;;  %vm20_vm1 = vcmask 0   ;;  %s208_s0 = inlined_call_operand.vmem [shape: f32[5,32], index: 0, kind: input, shape index: {}]   ;;  %s209_s1 = inlined_call_operand.vmem [shape: s8[5,32], index: 1, kind: input, shape index: {}]   ;;  %s210_s2 = inlined_call_operand.vmem [shape: f32[5,1], index: 2, kind: output, shape index: {0}]   ;;  %s211_s3 = inlined_call_operand.hbm [shape: s32[1,1], index: 3, kind: output, shape index: {1}]  }
   0x1   :  { %v23_v0 = vld [vmem:[%s209_s1] sm:$0x3] }
   0x2   :  { %v24_v1 = vunpack.c.0.s8 %v23_v0  ;;  %v22_v2 = vld [vmem:[%s208_s0] sm:$0x1f] }
   0x3   :  { %9 = vsyncpa [#allocation3], 0  ;;  %v151_v3 = vmov 0   ;;  %v43_v4 = vsel %vm33_vm0, %v22_v2, -inf  ;;  %v27_v13 = vlaneseq  ;;  %vm85_vm4 = vcmask 261120   ;;  %s153_s16 = smov [#allocation2]  }
   0x4   :  { %21 = vst.msk [vmem:[#allocation2] sm:$0x1] %vm20_vm1, %v151_v3  ;;  %v25_v5 = vcvt.s32.f32 %v24_v1  ;;  %v44_v6 = vrot.slane %v43_v4, 4  ;;  %vm18_vm6 = vcmask 4096   ;;  %v152_v55 = vmov 0.0   ;;  %s110_s17 = sshll.u32 %s153_s16, 4  ;;  %s111_s17 = int_to_ptr.vmem [resolvable:$true] %s110_s17 }
   0x5   :  { %v28_v18 = vand.u32 127, %v27_v13  ;;  %19 = vst.msk [vmem:[%s210_s2] sm:$0x1f] %vm18_vm6, %v152_v55  ;;  %s129_s18 = scalar_lea.vmem %s111_s17, 16  ;;  %s133_s19 = scalar_lea.vmem %s111_s17, 32 }
   0x6   :  { %v32_v7 = vand.u32 2147483647, %v25_v5  ;;  %v45_v8 = vmax.f32 %v43_v4, %v44_v6  ;;  %v70_v47 = vsub.f32 1.0, %v25_v5  ;;  %p130_p0 = scmp.ne.s32.totalorder %s111_s17, %s129_s18  ;;  %p134_p1 = scmp.lt.s32.totalorder %s111_s17, %s111_s17 }
   0x7   :  { %vm31_vm2 = vcmp.lt.s32.totalorder %v28_v18, 32  ;;  %p135_p2 = scmp.lt.s32.totalorder %s133_s19, %s129_s18 }
   0x8   :  { %v34_v9 = vsel %vm33_vm0, %v32_v7, -inf  ;;  %v46_v10 = vrot.slane %v45_v8, 2 }
   0x9   :  { %v35_v11 = vrot.slane %v34_v9, 4  ;;  %p136_p3 = por %p135_p2, %p134_p1 }
   0xa   :  { %v47_v12 = vmax.f32 %v45_v8, %v46_v10 }
   0xb   :  { %v36_v14 = vmax.f32 %v34_v9, %v35_v11  ;;  %v84_v61 = vld [vmem:[#allocation2] sm:$0x1]  ;;  %p137_p4 = pnand %p136_p3, %p130_p0 }
   0xc   :  { %v48_v15 = vrot.slane %v47_v12, 1 }
   0xd   :  { %v37_v16 = vrot.slane %v36_v14, 2 }
   0xe   :  { %v49_v17 = vmax.f32 %v47_v12, %v48_v15 }
   0xf   :  { %v38_v19 = vmax.f32 %v36_v14, %v37_v16 }
  0x10   :  { %v50_v20 = vsub.f32 %v22_v2, %v49_v17 }
  0x11   :  { %v39_v21 = vrot.slane %v38_v19, 1 }
  0x12   :  { %v51_v22 = vmul.f32 1.442695, %v50_v20 }
  0x13   :  { %v40_v23 = vmax.f32 %v38_v19, %v39_v21 }
  0x14   :  { %123 = vpow2.f32 %v51_v22 }
  0x15   :  { %vm41_vm3 = vcmp.gt.f32.partialorder %v40_v23, 0.0 }
  0x16   :  { %vm183_vm5 = vmand %vm41_vm3, %vm31_vm2 }
  0x17   :  { %v74_v25 = vsel %vm183_vm5, 1, %v151_v3 }
  0x18   :  { %v86_v26 = vsel %vm85_vm4, %v74_v25, 0 }
  0x19   :  { %v88_v27 = vshrl.u32 %v86_v26, 16  ;;  %v87_v28 = vand.u32 65535, %v86_v26 }
  0x1b   :  { %v90_v29 = vcvt.s32.f32 %v88_v27  ;;  %v89_v30 = vcvt.s32.f32 %v87_v28 }
  0x1d   :  { %93 = vadd.xlane.f32.xlu0 %v90_v29 }
  0x21   :  { %v124_v31 = vpop.eup %123  ;;  %91 = vadd.xlane.f32.xlu0 %v89_v30 }
  0x22   :  { %v53_v32 = vsel %vm33_vm0, %v124_v31, 0.0 }
  0x23   :  { %v54_v33 = vrot.slane %v53_v32, 4 }
  0x25   :  { %v55_v34 = vadd.f32 %v54_v33, %v53_v32 }
  0x27   :  { %v56_v35 = vrot.slane %v55_v34, 2 }
  0x29   :  { %v57_v36 = vadd.f32 %v56_v35, %v55_v34 }
  0x2b   :  { %v58_v37 = vrot.slane %v57_v36, 1 }
  0x2d   :  { %v59_v38 = vadd.f32 %v58_v37, %v57_v36 }
  0x2f   :  { %125 = vlog2.f32 %v59_v38  ;;  %v64_v39 = vsub.f32 %v59_v38, %v124_v31 }
  0x31   :  { %127 = vlog2.f32 %v64_v39 }
  0x3c   :  { %v126_v40 = vpop.eup %125 }
  0x3d   :  { %v61_v41 = vmul.f32 0.6931472, %v126_v40 }
  0x3e   :  { %v128_v42 = vpop.eup %127 }
  0x3f   :  { %v62_v43 = vsub.f32 %v50_v20, %v61_v41  ;;  %v66_v44 = vmul.f32 0.6931472, %v128_v42 }
  0x41   :  { %v63_v45 = vmax.f32 %v62_v43, -100.0  ;;  %v67_v46 = vsub.f32 %v66_v44, %v61_v41 }
  0x43   :  { %v68_v48 = vmax.f32 %v67_v46, -100.0  ;;  %v69_v49 = vmul.f32 %v63_v45, %v25_v5 }
  0x45   :  { %v71_v50 = vmul.f32 %v70_v47, %v68_v48 }
  0x47   :  { %v72_v51 = vadd.f32 %v71_v50, %v69_v49 }
  0x49   :  { %v73_v52 = vsub.f32 0.0, %v72_v51 }
  0x4b   :  { %v76_v53 = vsel %vm183_vm5, %v73_v52, 0.0 }
  0x4c   :  { %v78_v54 = vsel %vm33_vm0, %v76_v53, 0.0 }
  0x4d   :  { %79 = vadd.xlane.f32.xlu1 %v78_v54 }
  0xa6   :  { %v94_v56 = vpop.xlane.xlu0 %93 }
  0xa7   :  { %v96_v57 = vcvt.f32.s32 %v94_v56 }
  0xa9   :  { %v97_v58 = vshll.u32 %v96_v57, 16 }
  0xaa   :  { %v92_v59 = vpop.xlane.xlu0 %91 }
  0xab   :  { %v95_v60 = vcvt.f32.s32 %v92_v59 }
  0xad   :  { %v98_v62 = vadd.s32 %v97_v58, %v95_v60 }
  0xaf   :  { %v99_v63 = vadd.s32 %v98_v62, %v84_v61 }
  0xb1   :  { %101 = vst.msk [vmem:[#allocation2] sm:$0x1] %vm20_vm1, %v99_v63 }
  0xb2   :  { %140 = shalt.err (!%p137_p4)
}
  0xb3   :  { %113 = dma.vmem_to_hbm [thread:$0]  %s111_s17, 16, %s211_s3, [#allocation3]   ;;  %v77_v0 = vld [vmem:[%s210_s2] sm:$0x1f] }
  0xd6   :  { %v80_v1 = vpop.xlane.xlu1 %79 }
  0xd7   :  { %v81_v2 = vadd.f32 %v80_v1, %v77_v0 }
  0xd9   :  { %83 = vst.msk [vmem:[%s210_s2] sm:$0x1f] %vm18_vm6, %v81_v2 }
  0xda   :  { %149 = dma.done.wait [#allocation3], 16  }
  0xdb   :  { %150 = vsyncadd [#allocation3], 4294967280 }
  0xdc   :  { %119 = vsyncpa [#allocation3], 1 }

</bundles_post_ra>
